<compile_context>
chip_gen: v7x
topology: tpu7x:2x2x1
jax: 0.10.0
libtpu: 0.0.40
codegen_flags: <defaults>
</compile_context>

<pallas_src>
import functools

import jax
import jax.numpy as jnp
from jax.experimental import pallas as pl
from jax.experimental.pallas import tpu as pltpu

NUM_ITEMS = 25                   # 25 (k, v) pairs in in_out_map -> 75 outputs
NUM_GROUPS = 3                   # spinal (items 0-4), nfn (5-14), ss (15-24)
GROUP_SIZES = (5, 10, 10)
GROUP_OF_ITEM = tuple([0] * 5 + [1] * 10 + [2] * 10)
OUT_PAD = 128                    # lane-dense padded width of the 3-way head
NUM_OUT_COLS = 75

# Default map matches the conventional RSNA layout: item i reads x[:, i] and
# writes output[:, 3i:3i+3].
DEFAULT_IN_OUT_MAP = tuple((i, (3 * i, 3 * i + 1, 3 * i + 2))
                           for i in range(NUM_ITEMS))


def _grouped_mlp_kernel(x_sp_ref, x_nfn_ref, x_ss_ref,
                        w1_ref, b1_ref, w2_ref, b2_ref,
                        o_sp_ref, o_nfn_ref, o_ss_ref):
    """One grid step = one batch row-tile; three group-level 2-layer MLPs."""
    pairs = ((x_sp_ref, o_sp_ref), (x_nfn_ref, o_nfn_ref), (x_ss_ref, o_ss_ref))
    for g, (x_ref, o_ref) in enumerate(pairs):        # static unroll, 3 iters
        x = x_ref[...]                                # (n_g * tb, D)
        h = jnp.dot(x, w1_ref[g],
                    preferred_element_type=jnp.float32) + b1_ref[g]
        h = jnp.maximum(h, 0.0)
        o = jnp.dot(h, w2_ref[g],
                    preferred_element_type=jnp.float32) + b2_ref[g]
        o_ref[...] = o.astype(o_ref.dtype)            # full 128-lane store


def _pick_row_tile(B, D, row_tile):
    """Largest batch tile that keeps (8,128) alignment and fits an I/O budget."""
    if row_tile is not None:
        if row_tile == B or (B % row_tile == 0 and row_tile % 8 == 0):
            return row_tile
        return B
    budget = 8 << 20                                  # bytes, double-buffered I/O
    for tb in sorted((t for t in range(8, B, 8) if B % t == 0), reverse=True):
        io_bytes = 2 * NUM_ITEMS * tb * (D + OUT_PAD) * 4
        if io_bytes <= budget:
            return tb
    return B                                          # grid=1, full-extent blocks


@functools.partial(jax.jit, static_argnames=("in_out_map", "row_tile"))
def mlp_rsna9_v2_forward(x, w1, b1, w2, b2, *,
                         in_out_map=DEFAULT_IN_OUT_MAP, row_tile=None):
    """x: (B, n_items, D) float32; weights stored as (in, out). Returns (B, 75)."""
    B, n_items, D = x.shape
    assert len(in_out_map) == NUM_ITEMS
    n_sp, n_nfn, n_ss = GROUP_SIZES
    tb = _pick_row_tile(B, D, row_tile)

    # --- input gather per in_out_map (static), then group slabs -------------
    ks = tuple(int(k) for k, _ in in_out_map)
    if ks == tuple(range(NUM_ITEMS)) and n_items == NUM_ITEMS:
        x_sp, x_nfn, x_ss = x[:, 0:5], x[:, 5:15], x[:, 15:25]   # slice fast path
    else:
        xg = jnp.take(x, jnp.asarray(ks, dtype=jnp.int32), axis=1)
        x_sp, x_nfn, x_ss = xg[:, 0:5], xg[:, 5:15], xg[:, 15:25]
    x_sp = x_sp.reshape(B * n_sp, D)      # row = b * n_g + local_item
    x_nfn = x_nfn.reshape(B * n_nfn, D)
    x_ss = x_ss.reshape(B * n_ss, D)

    # Pad the 3-wide head to 128 lanes so kernel output stores are unmasked.
    w2p = jnp.zeros((NUM_GROUPS, D, OUT_PAD), w2.dtype).at[:, :, :3].set(w2)
    b2p = jnp.zeros((NUM_GROUPS, 1, OUT_PAD), b2.dtype).at[:, 0, :3].set(b2)
    b1r = b1.reshape(NUM_GROUPS, 1, D)

    grid = (B // tb,)
    const3 = lambda r: (0, 0, 0)                      # weights resident per step

    o_sp, o_nfn, o_ss = pl.pallas_call(
        _grouped_mlp_kernel,
        out_shape=(
            jax.ShapeDtypeStruct((B * n_sp, OUT_PAD), jnp.float32),
            jax.ShapeDtypeStruct((B * n_nfn, OUT_PAD), jnp.float32),
            jax.ShapeDtypeStruct((B * n_ss, OUT_PAD), jnp.float32),
        ),
        grid=grid,
        in_specs=[
            pl.BlockSpec((n_sp * tb, D), lambda r: (r, 0)),    # x spinal
            pl.BlockSpec((n_nfn * tb, D), lambda r: (r, 0)),   # x nfn
            pl.BlockSpec((n_ss * tb, D), lambda r: (r, 0)),    # x ss
            pl.BlockSpec((NUM_GROUPS, D, D), const3),          # W1 (all groups)
            pl.BlockSpec((NUM_GROUPS, 1, D), const3),          # b1
            pl.BlockSpec((NUM_GROUPS, D, OUT_PAD), const3),    # W2 (padded)
            pl.BlockSpec((NUM_GROUPS, 1, OUT_PAD), const3),    # b2 (padded)
        ],
        out_specs=(
            pl.BlockSpec((n_sp * tb, OUT_PAD), lambda r: (r, 0)),
            pl.BlockSpec((n_nfn * tb, OUT_PAD), lambda r: (r, 0)),
            pl.BlockSpec((n_ss * tb, OUT_PAD), lambda r: (r, 0)),
        ),
        compiler_params=pltpu.CompilerParams(
            dimension_semantics=("parallel",)),       # v7x: shard row tiles
    )(x_sp, x_nfn, x_ss, w1, b1r, w2p, b2p)

    # Item-ordered (B, 75): items are contiguous per group, batch-major rows.
    out_items = jnp.concatenate([
        o_sp[:, :3].reshape(B, n_sp * 3),
        o_nfn[:, :3].reshape(B, n_nfn * 3),
        o_ss[:, :3].reshape(B, n_ss * 3),
    ], axis=1)

    # Scatter item i's 3 columns into output[:, v_i] per in_out_map (static).
    v_flat = tuple(int(v) for _, vs in in_out_map for v in vs)
    if v_flat == tuple(range(NUM_OUT_COLS)):
        return out_items
    out = jnp.zeros((B, NUM_OUT_COLS), out_items.dtype)
    return out.at[:, jnp.asarray(v_flat, dtype=jnp.int32)].set(out_items)


def init_params(key, input_num):
    """Deterministic synthetic init of the three 2-layer MLPs.

    Weights are stored already transposed to (in, out) for x @ W."""
    D = input_num
    keys = jax.random.split(key, 12)
    w1 = jnp.stack([jax.random.normal(keys[i], (D, D), jnp.float32) * 0.05
                    for i in range(3)])                       # (3, D, D)
    b1 = jnp.stack([jax.random.normal(keys[3 + i], (D,), jnp.float32) * 0.05
                    for i in range(3)])                       # (3, D)
    w2 = jnp.stack([jax.random.normal(keys[6 + i], (D, 3), jnp.float32) * 0.05
                    for i in range(3)])                       # (3, D, 3)
    b2 = jnp.stack([jax.random.normal(keys[9 + i], (3,), jnp.float32) * 0.05
                    for i in range(3)])                       # (3, 3)
    return w1, b1, w2, b2


def reference_forward(x, w1, b1, w2, b2, in_out_map=DEFAULT_IN_OUT_MAP):
    """Pure-JAX reference replicating the PyTorch per-item loop + scatter."""
    B = x.shape[0]
    out = jnp.zeros((B, NUM_OUT_COLS), jnp.float32)
    for i, (k, vs) in enumerate(in_out_map):
        g = GROUP_OF_ITEM[i]
        h = jnp.maximum(x[:, k] @ w1[g] + b1[g], 0.0)
        o = h @ w2[g] + b2[g]
        out = out.at[:, jnp.asarray(vs)].set(o)
    return out


if __name__ == "__main__":
    B = 16
    INPUT_NUM = 64  # hidden size for the synthetic test

    key = jax.random.PRNGKey(0)
    kx, kp = jax.random.split(key)
    x = jax.random.normal(kx, (B, NUM_ITEMS, INPUT_NUM), jnp.float32)
    w1, b1, w2, b2 = init_params(kp, INPUT_NUM)

    # 1) Identity in_out_map (slice fast path, grid of 2 row-tiles of 8).
    out = mlp_rsna9_v2_forward(x, w1, b1, w2, b2)
    out = jax.block_until_ready(out)
    ref = reference_forward(x, w1, b1, w2, b2)
    assert out.shape == (B, NUM_OUT_COLS), out.shape
    err = float(jnp.max(jnp.abs(out - ref)))
    assert jnp.allclose(out, ref, atol=1e-4, rtol=1e-4), f"mismatch, max err {err}"

    # 2) Non-trivial in_out_map (gather + column scatter path).
    io_map2 = tuple((NUM_ITEMS - 1 - i,
                     (3 * ((i + 7) % NUM_ITEMS),
                      3 * ((i + 7) % NUM_ITEMS) + 1,
                      3 * ((i + 7) % NUM_ITEMS) + 2))
                    for i in range(NUM_ITEMS))
    out2 = mlp_rsna9_v2_forward(x, w1, b1, w2, b2, in_out_map=io_map2)
    out2 = jax.block_until_ready(out2)
    ref2 = reference_forward(x, w1, b1, w2, b2, in_out_map=io_map2)
    err2 = float(jnp.max(jnp.abs(out2 - ref2)))
    assert jnp.allclose(out2, ref2, atol=1e-4, rtol=1e-4), f"mismatch, max err {err2}"

    print("KERNEL_OK")
</pallas_src>

<mosaic_0001>
module attributes {stable_mosaic.version = 11 : i64} {
  func.func @_grouped_mlp_kernel(%arg0: i32, %arg1: memref<40x64xf32, #tpu.memory_space<vmem>>, %arg2: memref<80x64xf32, #tpu.memory_space<vmem>>, %arg3: memref<80x64xf32, #tpu.memory_space<vmem>>, %arg4: memref<3x64x64xf32, #tpu.memory_space<vmem>>, %arg5: memref<3x1x64xf32, #tpu.memory_space<vmem>>, %arg6: memref<3x64x128xf32, #tpu.memory_space<vmem>>, %arg7: memref<3x1x128xf32, #tpu.memory_space<vmem>>, %arg8: memref<40x128xf32, #tpu.memory_space<vmem>>, %arg9: memref<80x128xf32, #tpu.memory_space<vmem>>, %arg10: memref<80x128xf32, #tpu.memory_space<vmem>>) attributes {dimension_semantics = [#tpu.dimension_semantics<parallel>], iteration_bounds = array<i64: 2>, scalar_prefetch = 0 : i64, scratch_operands = 0 : i64, tpu.core_type = #tpu.core_type<tc>, window_params = [{transform_indices = @transform_0, window_bounds = array<i64: 40, 64>}, {transform_indices = @transform_1, window_bounds = array<i64: 80, 64>}, {transform_indices = @transform_2, window_bounds = array<i64: 80, 64>}, {pipeline_mode = #tpu.pipeline_mode<synchronous>, transform_indices = @transform_3, window_bounds = array<i64: 3, 64, 64>}, {pipeline_mode = #tpu.pipeline_mode<synchronous>, transform_indices = @transform_4, window_bounds = array<i64: 3, 1, 64>}, {pipeline_mode = #tpu.pipeline_mode<synchronous>, transform_indices = @transform_5, window_bounds = array<i64: 3, 64, 128>}, {pipeline_mode = #tpu.pipeline_mode<synchronous>, transform_indices = @transform_6, window_bounds = array<i64: 3, 1, 128>}, {transform_indices = @transform_7, window_bounds = array<i64: 40, 128>}, {transform_indices = @transform_8, window_bounds = array<i64: 80, 128>}, {transform_indices = @transform_9, window_bounds = array<i64: 80, 128>}]} {
    %c0 = arith.constant 0 : index
    %c0_0 = arith.constant 0 : index
    %0 = vector.load %arg1[%c0, %c0_0] : memref<40x64xf32, #tpu.memory_space<vmem>>, vector<40x64xf32>
    %c0_1 = arith.constant 0 : index
    %c0_2 = arith.constant 0 : index
    %c0_3 = arith.constant 0 : index
    %1 = vector.load %arg4[%c0_1, %c0_2, %c0_3] : memref<3x64x64xf32, #tpu.memory_space<vmem>>, vector<1x64x64xf32>
    %2 = vector.shape_cast %1 : vector<1x64x64xf32> to vector<64x64xf32>
    %cst = arith.constant dense<0.000000e+00> : vector<40x64xf32>
    %3 = tpu.matmul %0, %2, %cst {dimension_numbers = #tpu.dot_dimension_numbers<[1], [0], [0], [1], [0, 0, 1, 1], [], []>} : vector<40x64xf32>, vector<64x64xf32>, vector<40x64xf32> -> vector<40x64xf32>
    %c0_4 = arith.constant 0 : index
    %c0_5 = arith.constant 0 : index
    %c0_6 = arith.constant 0 : index
    %4 = vector.load %arg5[%c0_4, %c0_5, %c0_6] : memref<3x1x64xf32, #tpu.memory_space<vmem>>, vector<1x1x64xf32>
    %5 = vector.shape_cast %4 : vector<1x1x64xf32> to vector<1x64xf32>
    %6 = vector.broadcast %5 : vector<1x64xf32> to vector<40x64xf32>
    %7 = arith.addf %3, %6 : vector<40x64xf32>
    %cst_7 = arith.constant 0.000000e+00 : f32
    %8 = vector.broadcast %cst_7 : f32 to vector<40x64xf32>
    %9 = arith.maximumf %7, %8 : vector<40x64xf32>
    %c0_8 = arith.constant 0 : index
    %c0_9 = arith.constant 0 : index
    %c0_10 = arith.constant 0 : index
    %10 = vector.load %arg6[%c0_8, %c0_9, %c0_10] : memref<3x64x128xf32, #tpu.memory_space<vmem>>, vector<1x64x128xf32>
    %11 = vector.shape_cast %10 : vector<1x64x128xf32> to vector<64x128xf32>
    %cst_11 = arith.constant dense<0.000000e+00> : vector<40x128xf32>
    %12 = tpu.matmul %9, %11, %cst_11 {dimension_numbers = #tpu.dot_dimension_numbers<[1], [0], [0], [1], [0, 0, 1, 1], [], []>} : vector<40x64xf32>, vector<64x128xf32>, vector<40x128xf32> -> vector<40x128xf32>
    %c0_12 = arith.constant 0 : index
    %c0_13 = arith.constant 0 : index
    %c0_14 = arith.constant 0 : index
    %13 = vector.load %arg7[%c0_12, %c0_13, %c0_14] : memref<3x1x128xf32, #tpu.memory_space<vmem>>, vector<1x1x128xf32>
    %14 = vector.shape_cast %13 : vector<1x1x128xf32> to vector<1x128xf32>
    %15 = vector.broadcast %14 : vector<1x128xf32> to vector<40x128xf32>
    %16 = arith.addf %12, %15 : vector<40x128xf32>
    %c0_15 = arith.constant 0 : index
    %c0_16 = arith.constant 0 : index
    %17 = vector.load %arg8[%c0_15, %c0_16] : memref<40x128xf32, #tpu.memory_space<vmem>>, vector<40x128xf32>
    tpu.vector_store %arg8[%c0_15, %c0_16], %16 {strides = array<i32>} : memref<40x128xf32, #tpu.memory_space<vmem>>, vector<40x128xf32>,
    %c0_17 = arith.constant 0 : index
    %c0_18 = arith.constant 0 : index
    %18 = vector.load %arg2[%c0_17, %c0_18] : memref<80x64xf32, #tpu.memory_space<vmem>>, vector<80x64xf32>
    %c1 = arith.constant 1 : index
    %c0_19 = arith.constant 0 : index
    %c0_20 = arith.constant 0 : index
    %19 = vector.load %arg4[%c1, %c0_19, %c0_20] : memref<3x64x64xf32, #tpu.memory_space<vmem>>, vector<1x64x64xf32>
    %20 = vector.shape_cast %19 : vector<1x64x64xf32> to vector<64x64xf32>
    %cst_21 = arith.constant dense<0.000000e+00> : vector<80x64xf32>
    %21 = tpu.matmul %18, %20, %cst_21 {dimension_numbers = #tpu.dot_dimension_numbers<[1], [0], [0], [1], [0, 0, 1, 1], [], []>} : vector<80x64xf32>, vector<64x64xf32>, vector<80x64xf32> -> vector<80x64xf32>
    %c1_22 = arith.constant 1 : index
    %c0_23 = arith.constant 0 : index
    %c0_24 = arith.constant 0 : index
    %22 = vector.load %arg5[%c1_22, %c0_23, %c0_24] : memref<3x1x64xf32, #tpu.memory_space<vmem>>, vector<1x1x64xf32>
    %23 = vector.shape_cast %22 : vector<1x1x64xf32> to vector<1x64xf32>
    %24 = vector.broadcast %23 : vector<1x64xf32> to vector<80x64xf32>
    %25 = arith.addf %21, %24 : vector<80x64xf32>
    %cst_25 = arith.constant 0.000000e+00 : f32
    %26 = vector.broadcast %cst_25 : f32 to vector<80x64xf32>
    %27 = arith.maximumf %25, %26 : vector<80x64xf32>
    %c1_26 = arith.constant 1 : index
    %c0_27 = arith.constant 0 : index
    %c0_28 = arith.constant 0 : index
    %28 = vector.load %arg6[%c1_26, %c0_27, %c0_28] : memref<3x64x128xf32, #tpu.memory_space<vmem>>, vector<1x64x128xf32>
    %29 = vector.shape_cast %28 : vector<1x64x128xf32> to vector<64x128xf32>
    %cst_29 = arith.constant dense<0.000000e+00> : vector<80x128xf32>
    %30 = tpu.matmul %27, %29, %cst_29 {dimension_numbers = #tpu.dot_dimension_numbers<[1], [0], [0], [1], [0, 0, 1, 1], [], []>} : vector<80x64xf32>, vector<64x128xf32>, vector<80x128xf32> -> vector<80x128xf32>
    %c1_30 = arith.constant 1 : index
    %c0_31 = arith.constant 0 : index
    %c0_32 = arith.constant 0 : index
    %31 = vector.load %arg7[%c1_30, %c0_31, %c0_32] : memref<3x1x128xf32, #tpu.memory_space<vmem>>, vector<1x1x128xf32>
    %32 = vector.shape_cast %31 : vector<1x1x128xf32> to vector<1x128xf32>
    %33 = vector.broadcast %32 : vector<1x128xf32> to vector<80x128xf32>
    %34 = arith.addf %30, %33 : vector<80x128xf32>
    %c0_33 = arith.constant 0 : index
    %c0_34 = arith.constant 0 : index
    %35 = vector.load %arg9[%c0_33, %c0_34] : memref<80x128xf32, #tpu.memory_space<vmem>>, vector<80x128xf32>
    tpu.vector_store %arg9[%c0_33, %c0_34], %34 {strides = array<i32>} : memref<80x128xf32, #tpu.memory_space<vmem>>, vector<80x128xf32>,
    %c0_35 = arith.constant 0 : index
    %c0_36 = arith.constant 0 : index
    %36 = vector.load %arg3[%c0_35, %c0_36] : memref<80x64xf32, #tpu.memory_space<vmem>>, vector<80x64xf32>
    %c2 = arith.constant 2 : index
    %c0_37 = arith.constant 0 : index
    %c0_38 = arith.constant 0 : index
    %37 = vector.load %arg4[%c2, %c0_37, %c0_38] : memref<3x64x64xf32, #tpu.memory_space<vmem>>, vector<1x64x64xf32>
    %38 = vector.shape_cast %37 : vector<1x64x64xf32> to vector<64x64xf32>
    %cst_39 = arith.constant dense<0.000000e+00> : vector<80x64xf32>
    %39 = tpu.matmul %36, %38, %cst_39 {dimension_numbers = #tpu.dot_dimension_numbers<[1], [0], [0], [1], [0, 0, 1, 1], [], []>} : vector<80x64xf32>, vector<64x64xf32>, vector<80x64xf32> -> vector<80x64xf32>
    %c2_40 = arith.constant 2 : index
    %c0_41 = arith.constant 0 : index
    %c0_42 = arith.constant 0 : index
    %40 = vector.load %arg5[%c2_40, %c0_41, %c0_42] : memref<3x1x64xf32, #tpu.memory_space<vmem>>, vector<1x1x64xf32>
    %41 = vector.shape_cast %40 : vector<1x1x64xf32> to vector<1x64xf32>
    %42 = vector.broadcast %41 : vector<1x64xf32> to vector<80x64xf32>
    %43 = arith.addf %39, %42 : vector<80x64xf32>
    %cst_43 = arith.constant 0.000000e+00 : f32
    %44 = vector.broadcast %cst_43 : f32 to vector<80x64xf32>
    %45 = arith.maximumf %43, %44 : vector<80x64xf32>
    %c2_44 = arith.constant 2 : index
    %c0_45 = arith.constant 0 : index
    %c0_46 = arith.constant 0 : index
    %46 = vector.load %arg6[%c2_44, %c0_45, %c0_46] : memref<3x64x128xf32, #tpu.memory_space<vmem>>, vector<1x64x128xf32>
    %47 = vector.shape_cast %46 : vector<1x64x128xf32> to vector<64x128xf32>
    %cst_47 = arith.constant dense<0.000000e+00> : vector<80x128xf32>
    %48 = tpu.matmul %45, %47, %cst_47 {dimension_numbers = #tpu.dot_dimension_numbers<[1], [0], [0], [1], [0, 0, 1, 1], [], []>} : vector<80x64xf32>, vector<64x128xf32>, vector<80x128xf32> -> vector<80x128xf32>
    %c2_48 = arith.constant 2 : index
    %c0_49 = arith.constant 0 : index
    %c0_50 = arith.constant 0 : index
    %49 = vector.load %arg7[%c2_48, %c0_49, %c0_50] : memref<3x1x128xf32, #tpu.memory_space<vmem>>, vector<1x1x128xf32>
    %50 = vector.shape_cast %49 : vector<1x1x128xf32> to vector<1x128xf32>
    %51 = vector.broadcast %50 : vector<1x128xf32> to vector<80x128xf32>
    %52 = arith.addf %48, %51 : vector<80x128xf32>
    %c0_51 = arith.constant 0 : index
    %c0_52 = arith.constant 0 : index
    %53 = vector.load %arg10[%c0_51, %c0_52] : memref<80x128xf32, #tpu.memory_space<vmem>>, vector<80x128xf32>
    tpu.vector_store %arg10[%c0_51, %c0_52], %52 {strides = array<i32>} : memref<80x128xf32, #tpu.memory_space<vmem>>, vector<80x128xf32>,
    return
  }
  func.func @transform_0(%arg0: i32) -> (i32, i32) {
    %c0_i32 = arith.constant 0 : i32
    %c0_i32_0 = arith.constant 0 : i32
    return %arg0, %c0_i32 : i32, i32
  }
  func.func @transform_1(%arg0: i32) -> (i32, i32) {
    %c0_i32 = arith.constant 0 : i32
    %c0_i32_0 = arith.constant 0 : i32
    return %arg0, %c0_i32 : i32, i32
  }
  func.func @transform_2(%arg0: i32) -> (i32, i32) {
    %c0_i32 = arith.constant 0 : i32
    %c0_i32_0 = arith.constant 0 : i32
    return %arg0, %c0_i32 : i32, i32
  }
  func.func @transform_3(%arg0: i32) -> (i32, i32, i32) {
    %c0_i32 = arith.constant 0 : i32
    %c0_i32_0 = arith.constant 0 : i32
    %c0_i32_1 = arith.constant 0 : i32
    %c0_i32_2 = arith.constant 0 : i32
    return %c0_i32, %c0_i32_0, %c0_i32_1 : i32, i32, i32
  }
  func.func @transform_4(%arg0: i32) -> (i32, i32, i32) {
    %c0_i32 = arith.constant 0 : i32
    %c0_i32_0 = arith.constant 0 : i32
    %c0_i32_1 = arith.constant 0 : i32
    %c0_i32_2 = arith.constant 0 : i32
    return %c0_i32, %c0_i32_0, %c0_i32_1 : i32, i32, i32
  }
  func.func @transform_5(%arg0: i32) -> (i32, i32, i32) {
    %c0_i32 = arith.constant 0 : i32
    %c0_i32_0 = arith.constant 0 : i32
    %c0_i32_1 = arith.constant 0 : i32
    %c0_i32_2 = arith.constant 0 : i32
    return %c0_i32, %c0_i32_0, %c0_i32_1 : i32, i32, i32
  }
  func.func @transform_6(%arg0: i32) -> (i32, i32, i32) {
    %c0_i32 = arith.constant 0 : i32
    %c0_i32_0 = arith.constant 0 : i32
    %c0_i32_1 = arith.constant 0 : i32
    %c0_i32_2 = arith.constant 0 : i32
    return %c0_i32, %c0_i32_0, %c0_i32_1 : i32, i32, i32
  }
  func.func @transform_7(%arg0: i32) -> (i32, i32) {
    %c0_i32 = arith.constant 0 : i32
    %c0_i32_0 = arith.constant 0 : i32
    return %arg0, %c0_i32 : i32, i32
  }
  func.func @transform_8(%arg0: i32) -> (i32, i32) {
    %c0_i32 = arith.constant 0 : i32
    %c0_i32_0 = arith.constant 0 : i32
    return %arg0, %c0_i32 : i32, i32
  }
  func.func @transform_9(%arg0: i32) -> (i32, i32) {
    %c0_i32 = arith.constant 0 : i32
    %c0_i32_0 = arith.constant 0 : i32
    return %arg0, %c0_i32 : i32, i32
  }
}

</mosaic_0001>

<bundles_post_ra>
// kernel: mlp_rsna9_v2_forward.1
= control target key start
LH: loop header
LB: loop body
LE: loop exit
PB: predicated region body
PF: predicated region fallthrough
CT: control target
= control target key end

     0   :  { %s2068_s30 = smov 0   ;;  %s2386_s0 = inlined_call_operand.vmem [shape: f32[80,64], index: 0, kind: input, shape index: {}]   ;;  %s2387_s1 = inlined_call_operand.vmem [shape: f32[160,64], index: 1, kind: input, shape index: {}]   ;;  %s2388_s2 = inlined_call_operand.vmem [shape: f32[160,64], index: 2, kind: input, shape index: {}]   ;;  %s2389_s3 = inlined_call_operand.vmem [shape: f32[3,64,64], index: 3, kind: input, shape index: {}]   ;;  %s2390_s4 = inlined_call_operand.vmem [shape: f32[3,1,64], index: 4, kind: input, shape index: {}]   ;;  %s2391_s5 = inlined_call_operand.vmem [shape: f32[3,64,128], index: 5, kind: input, shape index: {}]   ;;  %s2392_s6 = inlined_call_operand.vmem [shape: f32[3,1,128], index: 6, kind: input, shape index: {}]   ;;  %s2393_s7 = inlined_call_operand.vmem [shape: f32[80,128], index: 7, kind: output, shape index: {0}]   ;;  %s2394_s8 = inlined_call_operand.vmem [shape: f32[160,128], index: 8, kind: output, shape index: {1}]   ;;  %s2395_s9 = inlined_call_operand.vmem [shape: f32[160,128], index: 9, kind: output, shape index: {2}]  }
   0x1 LB: > { %s1519_s10 = sadd.s32 4294967295, %s2013_s30   ;;  %p1523_p0 = scmp.ge.s32.totalorder %s2013_s30, 1  ;;  %s2013_s30 = sphi %s2068_s30, %s20_s30  }
   0x2   : > { %p315_p1 = scmp.lt.s32.totalorder %s2013_s30, 3 }
   0x4   : > { %p316_p2 = pnand %p1523_p0, %p315_p1 }
   0x5   : > { %v412_v0 = vld [vmem:[%s2389_s3] sm:$0xff] (!%p316_p2)  ;;  %v413_v1 = vld [vmem:[%s2389_s3 + $0x8] sm:$0xff] (!%p316_p2)  ;;  %v414_v2 = vld [vmem:[%s2389_s3 + $0x10] sm:$0xff] (!%p316_p2)  ;;  %v2015_v3 = vmov (!%p316_p2), 0.0|0.0   ;;  %vm2016_vm0 = vmmov (!%p316_p2), 0   ;;  %v2017_v6 = vmov (!%p316_p2), 0.0  }
   0x6   : > { %319 = sbr.rel (%p316_p2) target bundleno = 513 (0x201), region = 48  ;;  %1908 = vmatprep.subr.bf16.mxu0 (!%p316_p2), %v2015_v3  ;;  %v1909_v4 = vpack.c.bf16 (!%p316_p2), %v413_v1, %v412_v0  ;;  %v415_v5 = vld [vmem:[%s2389_s3 + $0x18] sm:$0xff] (!%p316_p2)  ;;  %1738 = vmatprep.mubr.msk.f32.mxu0 (!%p316_p2), %vm2016_vm0, %v2017_v6  ;;  %v416_v8 = vld [vmem:[%s2389_s3 + $0x20] sm:$0xff] (!%p316_p2)  ;;  %v417_v9 = vld [vmem:[%s2389_s3 + $0x28] sm:$0xff] (!%p316_p2)  ;;  %vm427_vm1 = vcmask (!%p316_p2), 523264  }
   0x7   : > { %s371_s19 = smul.u32 (!%p316_p2), 5, %s1519_s10  ;;  %1920 = vmatprep.subr.bf16.mxu1 (!%p316_p2), %v2015_v3  ;;  %1769 = vmatprep.mubr.msk.f32.mxu1 (!%p316_p2), %vm2016_vm0, %v2017_v6  ;;  %v1912_v7 = vpack.c.bf16 (!%p316_p2), %v415_v5, %v414_v2  ;;  %v1915_v10 = vpack.c.bf16 (!%p316_p2), %v417_v9, %v416_v8  ;;  %v418_v11 = vld [vmem:[%s2389_s3 + $0x30] sm:$0xff] (!%p316_p2)  ;;  %v419_v12 = vld [vmem:[%s2389_s3 + $0x38] sm:$0xff] (!%p316_p2)  ;;  %v538_v13 = vld [vmem:[%s2391_s5] sm:$0xff] (!%p316_p2) }
   0x8   : > { %1910 = vmatpush3.bf16.msra.mxu0 (!%p316_p2), %v1909_v4  ;;  %v539_v14 = vld [vmem:[%s2391_s5 + $0x8] sm:$0xff] (!%p316_p2)  ;;  %v1542_v15 = vld [vmem:[%s2389_s3 + $0x40] sm:$0xff] (!%p316_p2)  ;;  %v1918_v18 = vpack.c.bf16 (!%p316_p2), %v419_v12, %v418_v11  ;;  %v1544_v20 = vld [vmem:[%s2389_s3 + $0x50] sm:$0xff] (!%p316_p2)  ;;  %s377_s26 = smul.u32 (!%p316_p2), 10, %s1519_s10 }
   0x9   : > { %p372_p3 = scmp.lt.s32.totalorder (!%p316_p2), %s371_s19, 9  ;;  %1911 = vmatprep.subr.bf16.mxu0 (!%p316_p2), %v2015_v3  ;;  %v1543_v16 = vld [vmem:[%s2389_s3 + $0x48] sm:$0xff] (!%p316_p2)  ;;  %v1921_v17 = vpack.c.bf16 (!%p316_p2), %v539_v14, %v538_v13  ;;  %v1545_v21 = vld [vmem:[%s2389_s3 + $0x58] sm:$0xff] (!%p316_p2)  ;;  %v540_v23 = vld [vmem:[%s2391_s5 + $0x10] sm:$0xff] (!%p316_p2) }
   0xa   : > { %v1932_v19 = vpack.c.bf16 (!%p316_p2), %v1543_v16, %v1542_v15  ;;  %v1936_v24 = vpack.c.bf16 (!%p316_p2), %v1545_v21, %v1544_v20  ;;  %v1546_v25 = vld [vmem:[%s2389_s3 + $0x60] sm:$0xff] (!%p316_p2)  ;;  %v1547_v26 = vld [vmem:[%s2389_s3 + $0x68] sm:$0xff] (!%p316_p2)  ;;  %v541_v27 = vld [vmem:[%s2391_s5 + $0x18] sm:$0xff] (!%p316_p2)  ;;  %p378_p4 = scmp.lt.s32.totalorder (!%p316_p2), %s377_s26, 19 }
   0xb   : > { %1922 = vmatpush3.bf16.msra.mxu1 (!%p316_p2), %v1921_v17  ;;  %v542_v28 = vld [vmem:[%s2391_s5 + $0x20] sm:$0xff] (!%p316_p2)  ;;  %v1924_v29 = vpack.c.bf16 (!%p316_p2), %v541_v27, %v540_v23  ;;  %v543_v30 = vld [vmem:[%s2391_s5 + $0x28] sm:$0xff] (!%p316_p2)  ;;  %v1940_v32 = vpack.c.bf16 (!%p316_p2), %v1547_v26, %v1546_v25  ;;  %v1548_v34 = vld [vmem:[%s2389_s3 + $0x70] sm:$0xff] (!%p316_p2) }
   0xc   : > { %1913 = vmatpush3.bf16.msra.mxu0 (!%p316_p2), %v1912_v7  ;;  %1923 = vmatprep.subr.bf16.mxu1 (!%p316_p2), %v2015_v3  ;;  %v1927_v33 = vpack.c.bf16 (!%p316_p2), %v543_v30, %v542_v28  ;;  %v1549_v35 = vld [vmem:[%s2389_s3 + $0x78] sm:$0xff] (!%p316_p2)  ;;  %v1582_v38 = vld [vmem:[%s2389_s3 + $0x80] sm:$0xff] (!%p316_p2)  ;;  %v1583_v39 = vld [vmem:[%s2389_s3 + $0x88] sm:$0xff] (!%p316_p2) }
   0xd   : > { %s2397_s19 = smov (!%p372_p3, %s371_s19), 9  ;;  %1914 = vmatprep.subr.bf16.mxu0 %v2015_v3  ;;  %s2399_s26 = smov (!%p378_p4, %s377_s26), 19  ;;  %v1944_v37 = vpack.c.bf16 %v1549_v35, %v1548_v34  ;;  %v1964_v41 = vpack.c.bf16 %v1583_v39, %v1582_v38  ;;  %v1584_v44 = vld [vmem:[%s2389_s3 + $0x90] sm:$0xff]  ;;  %v1585_v45 = vld [vmem:[%s2389_s3 + $0x98] sm:$0xff]  ;;  %v1586_v49 = vld [vmem:[%s2389_s3 + $0xa0] sm:$0xff] }
   0xe   : > { %s1524_s13 = sshll.u32 %s2397_s19, 3  ;;  %s2185_s12 = sshll.u32 %s2399_s26, 3  ;;  %v1968_v48 = vpack.c.bf16 %v1585_v45, %v1584_v44  ;;  %v1587_v50 = vld [vmem:[%s2389_s3 + $0xa8] sm:$0xff]  ;;  %v1588_v54 = vld [vmem:[%s2389_s3 + $0xb0] sm:$0xff]  ;;  %v1589_v55 = vld [vmem:[%s2389_s3 + $0xb8] sm:$0xff] }
   0xf   : > { %s2131_s21 = scalar_lea.vmem %s2386_s0, %s1524_s13  ;;  %1925 = vmatpush3.bf16.msra.mxu1 %v1924_v29  ;;  %s2194_s10 = scalar_lea.vmem %s2387_s1, %s2185_s12  ;;  %v1972_v53 = vpack.c.bf16 %v1587_v50, %v1586_v49  ;;  %v1976_v58 = vpack.c.bf16 %v1589_v55, %v1588_v54  ;;  %v544_v9 = vld [vmem:[%s2391_s5 + $0x30] sm:$0xff]  ;;  %v1562_v12 = vld [vmem:[%s2391_s5 + $0x40] sm:$0xff]  ;;  %v1563_v13 = vld [vmem:[%s2391_s5 + $0x48] sm:$0xff] }
  0x10   : > { %1916 = vmatpush3.bf16.msra.mxu0 %v1915_v10  ;;  %v407_v22 = vld [vmem:[%s2131_s21] sm:$0xff]  ;;  %v408_v31 = vld [vmem:[%s2131_s21 + $0x8] sm:$0xff]  ;;  %1926 = vmatprep.subr.bf16.mxu1 %v2015_v3  ;;  %v409_v36 = vld [vmem:[%s2131_s21 + $0x10] sm:$0xff]  ;;  %s387_s14 = scalar_lea.vmem %s2388_s2, %s2185_s12  ;;  %v1948_v14 = vpack.c.bf16 %v1563_v13, %v1562_v12  ;;  %s393_s27 = scalar_lea.vmem %s2393_s7, %s1524_s13 }
  0x11   : > { %1917 = vmatprep.subr.bf16.mxu0 %v2015_v3  ;;  %v410_v40 = vld [vmem:[%s2131_s21 + $0x18] sm:$0xff]  ;;  %v411_v42 = vld [vmem:[%s2131_s21 + $0x20] sm:$0xff]  ;;  %v664_v46 = vld [vmem:[%s2194_s10 + $0x8] sm:$0xff]  ;;  %s2364_s11 = scalar_lea.vmem %s2394_s8, %s2185_s12  ;;  %s405_s16 = scalar_lea.vmem %s2395_s9, %s2185_s12 }
  0x12   : > { %v663_v43 = vld [vmem:[%s2194_s10] sm:$0xff]  ;;  %v665_v47 = vld [vmem:[%s2194_s10 + $0x10] sm:$0xff]  ;;  %v666_v51 = vld [vmem:[%s2194_s10 + $0x18] sm:$0xff] }
  0x13   : > { %1928 = vmatpush3.bf16.msra.mxu1 %v1927_v33  ;;  %v667_v52 = vld [vmem:[%s2194_s10 + $0x20] sm:$0xff]  ;;  %v668_v56 = vld [vmem:[%s2194_s10 + $0x28] sm:$0xff]  ;;  %v669_v57 = vld [vmem:[%s2194_s10 + $0x30] sm:$0xff] }
  0x14   : > { %1919 = vmatpush3.bf16.msra.mxu0 %v1918_v18  ;;  %1929 = vmatprep.subr.bf16.mxu1 %v2015_v3  ;;  %v670_v59 = vld [vmem:[%s2194_s10 + $0x38] sm:$0xff]  ;;  %v671_v60 = vld [vmem:[%s2194_s10 + $0x40] sm:$0xff]  ;;  %v672_v61 = vld [vmem:[%s2194_s10 + $0x48] sm:$0xff] }
  0x15   : > { %1933 = vmatprep.subr.bf16.mxu0 %v1932_v19  ;;  %v1017_v62 = vld [vmem:[%s387_s14] sm:$0xff]  ;;  %v1018_v63 = vld [vmem:[%s387_s14 + $0x8] sm:$0xff]  ;;  %v1019_v0 = vld [vmem:[%s387_s14 + $0x10] sm:$0xff] }
  0x16   : > { %v1020_v1 = vld [vmem:[%s387_s14 + $0x18] sm:$0xff]  ;;  %v1021_v2 = vld [vmem:[%s387_s14 + $0x20] sm:$0xff]  ;;  %v1022_v3 = vld [vmem:[%s387_s14 + $0x28] sm:$0xff] }
  0x17   : > { %1739 = vmatmul.mubr.msk.f32.vlgmr.msra.gmra.mrb[0].mxu0 %vm427_vm1, %v407_v22  ;;  %v1023_v4 = vld [vmem:[%s387_s14 + $0x30] sm:$0xff]  ;;  %v1024_v5 = vld [vmem:[%s387_s14 + $0x38] sm:$0xff]  ;;  %v1025_v7 = vld [vmem:[%s387_s14 + $0x40] sm:$0xff] }
  0x18   : > { %1935 = vmatpush3.bf16.msra.mxu0 %v1932_v19  ;;  %1741 = vmatprep.mubr.msk.f32.mxu0 %vm2016_vm0, %v2017_v6  ;;  %v1026_v8 = vld [vmem:[%s387_s14 + $0x48] sm:$0xff]  ;;  %v545_v10 = vld [vmem:[%s2391_s5 + $0x38] sm:$0xff]  ;;  %v1530_v15 = vld [vmem:[%s2390_s4] ss:$0 sm:$0xff] }
  0x19   : > { %1937 = vmatprep.subr.bf16.mxu0 %v1936_v24  ;;  %v1930_v11 = vpack.c.bf16 %v545_v10, %v544_v9  ;;  %v1564_v17 = vld [vmem:[%s2391_s5 + $0x50] sm:$0xff]  ;;  %v1565_v18 = vld [vmem:[%s2391_s5 + $0x58] sm:$0xff]  ;;  %v1567_v25 = vld [vmem:[%s2391_s5 + $0x68] sm:$0xff] }
  0x1a   : > { %v1952_v22 = vpack.c.bf16 %v1565_v18, %v1564_v17  ;;  %v1602_v38 = vld [vmem:[%s2391_s5 + $0x80] sm:$0xff]  ;;  %v1603_v39 = vld [vmem:[%s2391_s5 + $0x88] sm:$0xff] }
  0x1b   : > { %1742 = vmatmul.mubr.msk.f32.gmra.mrb[2].mxu0 %vm427_vm1, %v408_v31  ;;  %1931 = vmatpush3.bf16.msra.mxu1 %v1930_v11  ;;  %v1568_v31 = vld [vmem:[%s2391_s5 + $0x70] sm:$0xff] }
  0x1c   : > { %1939 = vmatpush3.bf16.msra.mxu0 %v1936_v24  ;;  %1744 = vmatprep.mubr.msk.f32.mxu0 %vm2016_vm0, %v2017_v6  ;;  %v1566_v24 = vld [vmem:[%s2391_s5 + $0x60] sm:$0xff] }
  0x1d   : > { %1941 = vmatprep.subr.bf16.mxu0 %v1940_v32  ;;  %1949 = vmatprep.subr.bf16.mxu1 %v1948_v14  ;;  %v1956_v29 = vpack.c.bf16 %v1567_v25, %v1566_v24 }
  0x1f   : > { %1745 = vmatmul.mubr.msk.f32.gmra.mrb[4].mxu0 %vm427_vm1, %v409_v36 }
  0x20   : > { %1747 = vmatprep.mubr.msk.f32.mxu0 %vm2016_vm0, %v2017_v6  ;;  %1943 = vmatpush3.bf16.msra.mxu0 %v1940_v32  ;;  %v1569_v32 = vld [vmem:[%s2391_s5 + $0x78] sm:$0xff] }
  0x21   : > { %1945 = vmatprep.subr.bf16.mxu0 %v1944_v37  ;;  %v1960_v36 = vpack.c.bf16 %v1569_v32, %v1568_v31 }
  0x23   : > { %1748 = vmatmul.mubr.msk.f32.gmra.mrb[6].mxu0 %vm427_vm1, %v410_v40 }
  0x24   : > { %1750 = vmatprep.mubr.msk.f32.mxu0 %vm2016_vm0, %v2017_v6  ;;  %1947 = vmatpush3.bf16.msra.mxu0 %v1944_v37 }
  0x25   : > { %1965 = vmatprep.subr.bf16.mxu0 %v1964_v41 }
  0x27   : > { %1751 = vmatmul.mubr.msk.f32.gmra.mrb[8].mxu0 %vm427_vm1, %v411_v42 }
  0x28   : > { %1800 = vmatprep.mubr.msk.f32.mxu0 %vm427_vm1, %v663_v43  ;;  %v1980_v43 = vpack.c.bf16 %v1603_v39, %v1602_v38 }
  0x2b   : > { %1801 = vmatmul.mubr.msk.f32.vlgmr.msra.gmra.mrb[10].mxu0 %vm427_vm1, %v664_v46 }
  0x2c   : > { %1967 = vmatpush3.bf16.msra.mxu0 %v1964_v41  ;;  %1803 = vmatprep.mubr.msk.f32.mxu0 %vm427_vm1, %v665_v47  ;;  %v1551_v47 = vld [vmem:[%s2390_s4 + $0x1] ss:$0 sm:$0xff] }
  0x2d   : > { %1969 = vmatprep.subr.bf16.mxu0 %v1968_v48 }
  0x2f   : > { %1804 = vmatmul.mubr.msk.f32.gmra.mrb[12].mxu0 %vm427_vm1, %v666_v51 }
  0x30   : > { %1971 = vmatpush3.bf16.msra.mxu0 %v1968_v48  ;;  %1806 = vmatprep.mubr.msk.f32.mxu0 %vm427_vm1, %v667_v52 }
  0x31   : > { %1973 = vmatprep.subr.bf16.mxu0 %v1972_v53 }
  0x33   : > { %1807 = vmatmul.mubr.msk.f32.gmra.mrb[14].mxu0 %vm427_vm1, %v668_v56 }
  0x34   : > { %1809 = vmatprep.mubr.msk.f32.mxu0 %vm427_vm1, %v669_v57  ;;  %1975 = vmatpush3.bf16.msra.mxu0 %v1972_v53  ;;  %v1604_v53 = vld [vmem:[%s2391_s5 + $0x90] sm:$0xff] }
  0x35   : > { %1977 = vmatprep.subr.bf16.mxu0 %v1976_v58 }
  0x37   : > { %1810 = vmatmul.mubr.msk.f32.gmra.mrb[16].mxu0 %vm427_vm1, %v670_v59 }
  0x38   : > { %1812 = vmatprep.mubr.msk.f32.mxu0 %vm427_vm1, %v671_v60  ;;  %1979 = vmatpush3.bf16.msra.mxu0 %v1976_v58 }
  0x3b   : > { %1813 = vmatmul.mubr.msk.f32.gmra.mrb[18].mxu0 %vm427_vm1, %v672_v61  ;;  %v1606_v61 = vld [vmem:[%s2391_s5 + $0xa0] sm:$0xff] }
  0x3c   : > { %1862 = vmatprep.mubr.msk.f32.mxu0 %vm427_vm1, %v1017_v62  ;;  %v1607_v62 = vld [vmem:[%s2391_s5 + $0xa8] sm:$0xff] }
  0x3f   : > { %1863 = vmatmul.mubr.msk.f32.vlgmr.msra.gmra.mrb[20].mxu0 %vm427_vm1, %v1018_v63 }
  0x40   : > { %1865 = vmatprep.mubr.msk.f32.mxu0 %vm427_vm1, %v1019_v0 }
  0x43   : > { %1866 = vmatmul.mubr.msk.f32.gmra.mrb[22].mxu0 %vm427_vm1, %v1020_v1 }
  0x44   : > { %1868 = vmatprep.mubr.msk.f32.mxu0 %vm427_vm1, %v1021_v2 }
  0x47   : > { %1869 = vmatmul.mubr.msk.f32.gmra.mrb[24].mxu0 %vm427_vm1, %v1022_v3 }
  0x48   : > { %1871 = vmatprep.mubr.msk.f32.mxu0 %vm427_vm1, %v1023_v4  ;;  %v1988_v4 = vpack.c.bf16 %v1607_v62, %v1606_v61 }
  0x4b   : > { %1872 = vmatmul.mubr.msk.f32.gmra.mrb[26].mxu0 %vm427_vm1, %v1024_v5 }
  0x4c   : > { %1874 = vmatprep.mubr.msk.f32.mxu0 %vm427_vm1, %v1025_v7  ;;  %v1608_v7 = vld [vmem:[%s2391_s5 + $0xb0] sm:$0xff] }
  0x4f   : > { %1875 = vmatmul.mubr.msk.f32.gmra.mrb[28].mxu0 %vm427_vm1, %v1026_v8  ;;  %v1609_v8 = vld [vmem:[%s2391_s5 + $0xb8] sm:$0xff] }
  0xea   : > { %v509_v16 = vpop.f32.mrb[0].mxu0 }
  0xeb   : > { %v510_v19 = vadd.f32 %v1530_v15, %v509_v16  ;;  %v1740_v20 = vpop.f32.mrb[1].mxu0 }
  0xed   : > { %v533_v21 = vmax.f32 %v510_v19, 0.0 }
  0xee   : > { %v514_v23 = vpop.f32.mrb[2].mxu0 }
  0xef   : > { %v515_v26 = vadd.f32 %v1530_v15, %v514_v23  ;;  %v1743_v27 = vpop.f32.mrb[3].mxu0  ;;  %1770 = vmatmul.mubr.msk.f32.vlgmr.msra.gmra.mrb[0].mxu1 %vm427_vm1, %v533_v21 }
  0xf0   : > { %1772 = vmatprep.mubr.msk.f32.mxu1 %vm2016_vm0, %v2017_v6  ;;  %1951 = vmatpush3.bf16.msra.mxu1 %v1948_v14  ;;  %v1992_v14 = vpack.c.bf16 %v1609_v8, %v1608_v7  ;;  %v1571_v7 = vld [vmem:[%s2392_s6 + $0x1] ss:$0 sm:$0xff] }
  0xf1   : > { %v534_v28 = vmax.f32 %v515_v26, 0.0  ;;  %1953 = vmatprep.subr.bf16.mxu1 %v1952_v22 }
  0xf2   : > { %v519_v30 = vpop.f32.mrb[4].mxu0 }
  0xf3   : > { %v520_v33 = vadd.f32 %v1530_v15, %v519_v30  ;;  %v1746_v34 = vpop.f32.mrb[5].mxu0  ;;  %1773 = vmatmul.mubr.msk.f32.gmra.mrb[2].mxu1 %vm427_vm1, %v534_v28 }
  0xf4   : > { %1775 = vmatprep.mubr.msk.f32.mxu1 %vm2016_vm0, %v2017_v6  ;;  %1955 = vmatpush3.bf16.msra.mxu1 %v1952_v22  ;;  %v1591_v22 = vld [vmem:[%s2390_s4 + $0x2] ss:$0 sm:$0xff] }
  0xf5   : > { %v535_v35 = vmax.f32 %v520_v33, 0.0  ;;  %1957 = vmatprep.subr.bf16.mxu1 %v1956_v29 }
  0xf6   : > { %v524_v37 = vpop.f32.mrb[6].mxu0 }
  0xf7   : > { %v525_v40 = vadd.f32 %v1530_v15, %v524_v37  ;;  %v1749_v41 = vpop.f32.mrb[7].mxu0  ;;  %1776 = vmatmul.mubr.msk.f32.gmra.mrb[4].mxu1 %vm427_vm1, %v535_v35 }
  0xf8   : > { %1778 = vmatprep.mubr.msk.f32.mxu1 %vm2016_vm0, %v2017_v6  ;;  %1959 = vmatpush3.bf16.msra.mxu1 %v1956_v29 }
  0xf9   : > { %v536_v42 = vmax.f32 %v525_v40, 0.0  ;;  %1961 = vmatprep.subr.bf16.mxu1 %v1960_v36 }
  0xfa   : > { %v529_v44 = vpop.f32.mrb[8].mxu0 }
  0xfb   : > { %v530_v45 = vadd.f32 %v1530_v15, %v529_v44  ;;  %v1752_v46 = vpop.f32.mrb[9].mxu0  ;;  %1779 = vmatmul.mubr.msk.f32.gmra.mrb[6].mxu1 %vm427_vm1, %v536_v42 }
  0xfc   : > { %1781 = vmatprep.mubr.msk.f32.mxu1 %vm2016_vm0, %v2017_v6  ;;  %1963 = vmatpush3.bf16.msra.mxu1 %v1960_v36  ;;  %v1605_v6 = vld [vmem:[%s2391_s5 + $0x98] sm:$0xff] }
  0xfd   : > { %v537_v48 = vmax.f32 %v530_v45, 0.0  ;;  %1981 = vmatprep.subr.bf16.mxu1 %v1980_v43  ;;  %v1984_v59 = vpack.c.bf16 %v1605_v6, %v1604_v53 }
  0xfe   : > { %v1802_v49 = vpop.f32.mrb[10].mxu0 }
  0xff   : > { %v792_v50 = vadd.f32 %v1802_v49, %v1551_v47  ;;  %1782 = vmatmul.mubr.msk.f32.gmra.mrb[8].mxu1 %vm427_vm1, %v537_v48  ;;  %v786_v51 = vpop.f32.mrb[11].mxu0 }
 0x100   : > { %v787_v52 = vadd.f32 %v1551_v47, %v786_v51 }
 0x101   : > { %v836_v56 = vmax.f32 %v792_v50, 0.0 }
 0x102   : > { %v835_v54 = vmax.f32 %v787_v52, 0.0  ;;  %v1805_v55 = vpop.f32.mrb[12].mxu0 }
 0x103   : > { %v802_v57 = vadd.f32 %v1805_v55, %v1551_v47  ;;  %v796_v58 = vpop.f32.mrb[13].mxu0 }
 0x104   : > { %v797_v60 = vadd.f32 %v1551_v47, %v796_v58  ;;  %1831 = vmatprep.mubr.msk.f32.mxu1 %vm427_vm1, %v835_v54  ;;  %v1536_v54 = vld [vmem:[%s2392_s6] ss:$0 sm:$0xff] }
 0x105   : > { %1832 = vmatmul.mubr.msk.f32.vlgmr.msra.gmra.mrb[10].mxu1 %vm427_vm1, %v836_v56  ;;  %v838_v1 = vmax.f32 %v802_v57, 0.0 }
 0x106   : > { %v837_v63 = vmax.f32 %v797_v60, 0.0  ;;  %v1808_v0 = vpop.f32.mrb[14].mxu0  ;;  %1983 = vmatpush3.bf16.msra.mxu1 %v1980_v43 }
 0x107   : > { %v812_v2 = vadd.f32 %v1808_v0, %v1551_v47  ;;  %v806_v3 = vpop.f32.mrb[15].mxu0  ;;  %1985 = vmatprep.subr.bf16.mxu1 %v1984_v59 }
 0x108   : > { %v807_v5 = vadd.f32 %v1551_v47, %v806_v3  ;;  %1834 = vmatprep.mubr.msk.f32.mxu1 %vm427_vm1, %v837_v63 }
 0x109   : > { %1835 = vmatmul.mubr.msk.f32.gmra.mrb[12].mxu1 %vm427_vm1, %v838_v1  ;;  %v840_v11 = vmax.f32 %v812_v2, 0.0 }
 0x10a   : > { %v839_v9 = vmax.f32 %v807_v5, 0.0  ;;  %v1811_v10 = vpop.f32.mrb[16].mxu0  ;;  %1987 = vmatpush3.bf16.msra.mxu1 %v1984_v59 }
 0x10b   : > { %v822_v12 = vadd.f32 %v1811_v10, %v1551_v47  ;;  %v816_v13 = vpop.f32.mrb[17].mxu0  ;;  %1989 = vmatprep.subr.bf16.mxu1 %v1988_v4 }
 0x10c   : > { %v817_v15 = vadd.f32 %v1551_v47, %v816_v13  ;;  %1837 = vmatprep.mubr.msk.f32.mxu1 %vm427_vm1, %v839_v9 }
 0x10d   : > { %1838 = vmatmul.mubr.msk.f32.gmra.mrb[14].mxu1 %vm427_vm1, %v840_v11  ;;  %v842_v18 = vmax.f32 %v822_v12, 0.0 }
 0x10e   : > { %v841_v16 = vmax.f32 %v817_v15, 0.0  ;;  %v1814_v17 = vpop.f32.mrb[18].mxu0  ;;  %1991 = vmatpush3.bf16.msra.mxu1 %v1988_v4 }
 0x10f   : > { %v832_v19 = vadd.f32 %v1814_v17, %v1551_v47  ;;  %v826_v20 = vpop.f32.mrb[19].mxu0  ;;  %1993 = vmatprep.subr.bf16.mxu1 %v1992_v14 }
 0x110   : > { %v827_v21 = vadd.f32 %v1551_v47, %v826_v20  ;;  %1840 = vmatprep.mubr.msk.f32.mxu1 %vm427_vm1, %v841_v16 }
 0x111   : > { %1841 = vmatmul.mubr.msk.f32.gmra.mrb[16].mxu1 %vm427_vm1, %v842_v18  ;;  %v844_v25 = vmax.f32 %v832_v19, 0.0 }
 0x112   : > { %v843_v23 = vmax.f32 %v827_v21, 0.0  ;;  %v1864_v24 = vpop.f32.mrb[20].mxu0  ;;  %1995 = vmatpush3.bf16.msra.mxu1 %v1992_v14 }
 0x113   : > { %v1146_v26 = vadd.f32 %v1864_v24, %v1591_v22  ;;  %v1140_v27 = vpop.f32.mrb[21].mxu0 }
 0x114   : > { %v1141_v28 = vadd.f32 %v1591_v22, %v1140_v27  ;;  %1843 = vmatprep.mubr.msk.f32.mxu1 %vm427_vm1, %v843_v23 }
 0x115   : > { %1844 = vmatmul.mubr.msk.f32.gmra.mrb[18].mxu1 %vm427_vm1, %v844_v25  ;;  %v1190_v31 = vmax.f32 %v1146_v26, 0.0 }
 0x116   : > { %v1189_v29 = vmax.f32 %v1141_v28, 0.0  ;;  %v1867_v30 = vpop.f32.mrb[22].mxu0  ;;  %v1611_v28 = vld [vmem:[%s2392_s6 + $0x2] ss:$0 sm:$0xff] }
 0x117   : > { %v1156_v32 = vadd.f32 %v1867_v30, %v1591_v22  ;;  %v1150_v33 = vpop.f32.mrb[23].mxu0 }
 0x118   : > { %v1151_v34 = vadd.f32 %v1591_v22, %v1150_v33  ;;  %1893 = vmatprep.mubr.msk.f32.mxu1 %vm427_vm1, %v1189_v29 }
 0x119   : > { %1894 = vmatmul.mubr.msk.f32.vlgmr.msra.gmra.mrb[20].mxu1 %vm427_vm1, %v1190_v31  ;;  %v1192_v37 = vmax.f32 %v1156_v32, 0.0 }
 0x11a   : > { %v1191_v35 = vmax.f32 %v1151_v34, 0.0  ;;  %v1870_v36 = vpop.f32.mrb[24].mxu0 }
 0x11b   : > { %v1166_v38 = vadd.f32 %v1870_v36, %v1591_v22  ;;  %v1160_v39 = vpop.f32.mrb[25].mxu0 }
 0x11c   : > { %v1161_v40 = vadd.f32 %v1591_v22, %v1160_v39  ;;  %1896 = vmatprep.mubr.msk.f32.mxu1 %vm427_vm1, %v1191_v35 }
 0x11d   : > { %1897 = vmatmul.mubr.msk.f32.gmra.mrb[22].mxu1 %vm427_vm1, %v1192_v37  ;;  %v1194_v43 = vmax.f32 %v1166_v38, 0.0 }
 0x11e   : > { %v1193_v41 = vmax.f32 %v1161_v40, 0.0  ;;  %v1873_v42 = vpop.f32.mrb[26].mxu0 }
 0x11f   : > { %v1176_v44 = vadd.f32 %v1873_v42, %v1591_v22  ;;  %v1170_v45 = vpop.f32.mrb[27].mxu0 }
 0x120   : > { %v1171_v46 = vadd.f32 %v1591_v22, %v1170_v45  ;;  %1899 = vmatprep.mubr.msk.f32.mxu1 %vm427_vm1, %v1193_v41 }
 0x121   : > { %1900 = vmatmul.mubr.msk.f32.gmra.mrb[24].mxu1 %vm427_vm1, %v1194_v43  ;;  %v1196_v49 = vmax.f32 %v1176_v44, 0.0 }
 0x122   : > { %v1195_v47 = vmax.f32 %v1171_v46, 0.0  ;;  %v1876_v48 = vpop.f32.mrb[28].mxu0 }
 0x123   : > { %v1186_v50 = vadd.f32 %v1876_v48, %v1591_v22  ;;  %v1180_v51 = vpop.f32.mrb[29].mxu0 }
 0x124   : > { %v1181_v52 = vadd.f32 %v1591_v22, %v1180_v51  ;;  %1902 = vmatprep.mubr.msk.f32.mxu1 %vm427_vm1, %v1195_v47 }
 0x125   : > { %1903 = vmatmul.mubr.msk.f32.gmra.mrb[26].mxu1 %vm427_vm1, %v1196_v49  ;;  %v1198_v6 = vmax.f32 %v1186_v50, 0.0 }
 0x126   : > { %v1197_v53 = vmax.f32 %v1181_v52, 0.0 }
 0x128   : > { %1905 = vmatprep.mubr.msk.f32.mxu1 %vm427_vm1, %v1197_v53 }
 0x129   : > { %1906 = vmatmul.mubr.msk.f32.gmra.mrb[28].mxu1 %vm427_vm1, %v1198_v6 }
 0x1c2   : > { %v634_v55 = vpop.f32.mrb[0].mxu1 }
 0x1c3   : > { %v635_v56 = vadd.f32 %v1536_v54, %v634_v55  ;;  %v1771_v57 = vpop.f32.mrb[1].mxu1 }
 0x1c5   : > { %658 = vst [vmem:[%s393_s27] sm:$0xff] %v635_v56 }
 0x1c6   : > { %v639_v58 = vpop.f32.mrb[2].mxu1 }
 0x1c7   : > { %v640_v59 = vadd.f32 %v1536_v54, %v639_v58  ;;  %v1774_v60 = vpop.f32.mrb[3].mxu1 }
 0x1c9   : > { %659 = vst [vmem:[%s393_s27 + $0x8] sm:$0xff] %v640_v59 }
 0x1ca   : > { %v644_v61 = vpop.f32.mrb[4].mxu1 }
 0x1cb   : > { %v645_v62 = vadd.f32 %v1536_v54, %v644_v61  ;;  %v1777_v63 = vpop.f32.mrb[5].mxu1 }
 0x1cd   : > { %660 = vst [vmem:[%s393_s27 + $0x10] sm:$0xff] %v645_v62 }
 0x1ce   : > { %v649_v0 = vpop.f32.mrb[6].mxu1 }
 0x1cf   : > { %v650_v1 = vadd.f32 %v1536_v54, %v649_v0  ;;  %v1780_v2 = vpop.f32.mrb[7].mxu1 }
 0x1d1   : > { %661 = vst [vmem:[%s393_s27 + $0x18] sm:$0xff] %v650_v1 }
 0x1d2   : > { %v654_v3 = vpop.f32.mrb[8].mxu1 }
 0x1d3   : > { %v655_v4 = vadd.f32 %v1536_v54, %v654_v3  ;;  %v1783_v5 = vpop.f32.mrb[9].mxu1 }
 0x1d5   : > { %662 = vst [vmem:[%s393_s27 + $0x20] sm:$0xff] %v655_v4 }
 0x1d8   : > { %v1833_v8 = vpop.f32.mrb[10].mxu1 }
 0x1d9   : > { %v964_v9 = vadd.f32 %v1833_v8, %v1571_v7  ;;  %v958_v10 = vpop.f32.mrb[11].mxu1 }
 0x1da   : > { %v959_v11 = vadd.f32 %v1571_v7, %v958_v10 }
 0x1db   : > { %1008 = vst [vmem:[%s2364_s11 + $0x8] sm:$0xff] %v964_v9 }
 0x1dc   : > { %1007 = vst [vmem:[%s2364_s11] sm:$0xff] %v959_v11  ;;  %v1836_v12 = vpop.f32.mrb[12].mxu1 }
 0x1dd   : > { %v974_v13 = vadd.f32 %v1836_v12, %v1571_v7  ;;  %v968_v14 = vpop.f32.mrb[13].mxu1 }
 0x1de   : > { %v969_v15 = vadd.f32 %v1571_v7, %v968_v14 }
 0x1df   : > { %1010 = vst [vmem:[%s2364_s11 + $0x18] sm:$0xff] %v974_v13 }
 0x1e0   : > { %1009 = vst [vmem:[%s2364_s11 + $0x10] sm:$0xff] %v969_v15  ;;  %v1839_v16 = vpop.f32.mrb[14].mxu1 }
 0x1e1   : > { %v984_v17 = vadd.f32 %v1839_v16, %v1571_v7  ;;  %v978_v18 = vpop.f32.mrb[15].mxu1 }
 0x1e2   : > { %v979_v19 = vadd.f32 %v1571_v7, %v978_v18 }
 0x1e3   : > { %1012 = vst [vmem:[%s2364_s11 + $0x28] sm:$0xff] %v984_v17 }
 0x1e4   : > { %1011 = vst [vmem:[%s2364_s11 + $0x20] sm:$0xff] %v979_v19  ;;  %v1842_v20 = vpop.f32.mrb[16].mxu1 }
 0x1e5   : > { %v994_v21 = vadd.f32 %v1842_v20, %v1571_v7  ;;  %v988_v22 = vpop.f32.mrb[17].mxu1 }
 0x1e6   : > { %v989_v23 = vadd.f32 %v1571_v7, %v988_v22 }
 0x1e7   : > { %1014 = vst [vmem:[%s2364_s11 + $0x38] sm:$0xff] %v994_v21 }
 0x1e8   : > { %1013 = vst [vmem:[%s2364_s11 + $0x30] sm:$0xff] %v989_v23  ;;  %v1845_v24 = vpop.f32.mrb[18].mxu1 }
 0x1e9   : > { %v1004_v25 = vadd.f32 %v1845_v24, %v1571_v7  ;;  %v998_v26 = vpop.f32.mrb[19].mxu1 }
 0x1ea   : > { %v999_v27 = vadd.f32 %v1571_v7, %v998_v26 }
 0x1eb   : > { %1016 = vst [vmem:[%s2364_s11 + $0x48] sm:$0xff] %v1004_v25 }
 0x1ec   : > { %1015 = vst [vmem:[%s2364_s11 + $0x40] sm:$0xff] %v999_v27  ;;  %v1895_v29 = vpop.f32.mrb[20].mxu1 }
 0x1ed   : > { %v1318_v30 = vadd.f32 %v1895_v29, %v1611_v28  ;;  %v1312_v31 = vpop.f32.mrb[21].mxu1 }
 0x1ee   : > { %v1313_v32 = vadd.f32 %v1611_v28, %v1312_v31 }
 0x1ef   : > { %1362 = vst [vmem:[%s405_s16 + $0x8] sm:$0xff] %v1318_v30 }
 0x1f0   : > { %1361 = vst [vmem:[%s405_s16] sm:$0xff] %v1313_v32  ;;  %v1898_v33 = vpop.f32.mrb[22].mxu1 }
 0x1f1   : > { %v1328_v34 = vadd.f32 %v1898_v33, %v1611_v28  ;;  %v1322_v35 = vpop.f32.mrb[23].mxu1 }
 0x1f2   : > { %v1323_v36 = vadd.f32 %v1611_v28, %v1322_v35 }
 0x1f3   : > { %1364 = vst [vmem:[%s405_s16 + $0x18] sm:$0xff] %v1328_v34 }
 0x1f4   : > { %1363 = vst [vmem:[%s405_s16 + $0x10] sm:$0xff] %v1323_v36  ;;  %v1901_v37 = vpop.f32.mrb[24].mxu1 }
 0x1f5   : > { %v1338_v38 = vadd.f32 %v1901_v37, %v1611_v28  ;;  %v1332_v39 = vpop.f32.mrb[25].mxu1 }
 0x1f6   : > { %v1333_v40 = vadd.f32 %v1611_v28, %v1332_v39 }
 0x1f7   : > { %1366 = vst [vmem:[%s405_s16 + $0x28] sm:$0xff] %v1338_v38 }
 0x1f8   : > { %1365 = vst [vmem:[%s405_s16 + $0x20] sm:$0xff] %v1333_v40  ;;  %v1904_v41 = vpop.f32.mrb[26].mxu1 }
 0x1f9   : > { %v1348_v42 = vadd.f32 %v1904_v41, %v1611_v28  ;;  %v1342_v43 = vpop.f32.mrb[27].mxu1 }
 0x1fa   : > { %v1343_v44 = vadd.f32 %v1611_v28, %v1342_v43 }
 0x1fb   : > { %1368 = vst [vmem:[%s405_s16 + $0x38] sm:$0xff] %v1348_v42 }
 0x1fc   : > { %1367 = vst [vmem:[%s405_s16 + $0x30] sm:$0xff] %v1343_v44  ;;  %v1907_v45 = vpop.f32.mrb[28].mxu1 }
 0x1fd   : > { %v1358_v46 = vadd.f32 %v1907_v45, %v1611_v28  ;;  %v1352_v47 = vpop.f32.mrb[29].mxu1 }
 0x1fe   : > { %v1353_v48 = vadd.f32 %v1611_v28, %v1352_v47 }
 0x1ff   : > { %1370 = vst [vmem:[%s405_s16 + $0x48] sm:$0xff] %v1358_v46 }
 0x200   : > { %1369 = vst [vmem:[%s405_s16 + $0x40] sm:$0xff] %v1353_v48 }
 0x201 PF: > { %s20_s30 = sadd.s32 1, %s2013_s30  }
 0x202   : > { %p17_p5 = scmp.ge.s32.totalorder %s20_s30, 4  }
 0x204   :  { %19 = sbr.rel (!%p17_p5) target bundleno = 1 (0x1), region = 116 }

</bundles_post_ra>
